<compile_context>
chip_gen: v5e
topology: v5e:2x2
jax: 0.10.0
libtpu: 0.0.40
codegen_flags: <defaults>
</compile_context>

<pallas_src>
import jax
import jax.numpy as jnp
from jax.experimental import pallas as pl
from jax.experimental.pallas import tpu as pltpu


def _bilinear_upsample_matrix(h: int) -> jnp.ndarray:
    """(2h, h) matrix for nn.Upsample(scale_factor=2, mode='bilinear',
    align_corners=False) along one axis."""
    ho = 2 * h
    i = jnp.arange(ho, dtype=jnp.float32)
    # PyTorch: src = (dst + 0.5) * (1/scale) - 0.5, clamped at 0 for non-cubic.
    src = jnp.maximum((i + 0.5) * 0.5 - 0.5, 0.0)
    i0 = jnp.minimum(jnp.floor(src).astype(jnp.int32), h - 1)
    i1 = jnp.minimum(i0 + 1, h - 1)
    lam = src - i0.astype(jnp.float32)
    rows = jnp.arange(ho)
    a = jnp.zeros((ho, h), dtype=jnp.float32)
    a = a.at[rows, i0].add(1.0 - lam)
    a = a.at[rows, i1].add(lam)
    return a


def _smooth_matrix(n: int) -> jnp.ndarray:
    """(n, n) matrix implementing ReplicationPad1d(1) + conv with [1,2,1]/4."""
    idx = jnp.arange(n)
    s = jnp.zeros((n, n), dtype=jnp.float32)
    s = s.at[idx, jnp.clip(idx - 1, 0, n - 1)].add(0.25)
    s = s.at[idx, idx].add(0.5)
    s = s.at[idx, jnp.clip(idx + 1, 0, n - 1)].add(0.25)
    return s


def _upsample_smooth_kernel(x_ref, mh_ref, mwt_ref, o_ref):
    # x_ref:   (TB, H, W)    float32 -- natural NCHW layout, W on lanes
    # mh_ref:  (Ho, H)       float32 -- smooth @ bilinear-upsample (row axis)
    # mwt_ref: (W, Wo)       float32 -- (smooth @ bilinear-upsample)^T (col axis)
    # o_ref:   (TB, Ho, Wo)  float32
    tb, h, w = x_ref.shape
    ho = mh_ref.shape[0]
    wo = mwt_ref.shape[1]

    x = x_ref[...]
    # Broadcast the small constant matrices to a batch dim so both passes are
    # plain batched matmuls (no cross-lane reshapes / result transposes).
    mwt_b = jnp.broadcast_to(mwt_ref[...], (tb, w, wo))
    mh_b = jnp.broadcast_to(mh_ref[...], (tb, ho, h))

    # Width pass: contract W (lane dim of x) -> (TB, H, Wo), Wo on lanes.
    t = jnp.einsum("bhw,bwv->bhv", x, mwt_b,
                   preferred_element_type=jnp.float32)
    # Height pass: contract H -> (TB, Ho, Wo), f32 accumulation on the MXU.
    y = jnp.einsum("boh,bhv->bov", mh_b, t,
                   preferred_element_type=jnp.float32)
    o_ref[...] = y


def _choose_tb(b: int, h: int, w: int, out_block_target: int = 4 << 20):
    """Images per grid step and number of grid steps.

    Targets ~4 MiB of f32 output per step (big enough to amortize the ~0.35 us
    per-step overhead on v5e/v6e, small enough for v7x's 64 MiB VMEM once
    double-buffered), and prefers an even step count >= 4 so v7x's two
    TensorCores each get >= 2 steps of pipelined work."""
    cdiv = lambda a, d: -(-a // d)
    ho, wo = 2 * h, 2 * w
    tb_cap = max(1, out_block_target // (ho * wo * 4))
    num_steps = cdiv(b, tb_cap)
    if b >= 4:
        num_steps = max(num_steps, 4)
        if num_steps % 2:
            num_steps += 1
    tb = cdiv(b, num_steps)
    return tb, num_steps


def upsample_smooth(x: jnp.ndarray) -> jnp.ndarray:
    """x: (N, C, H, W) float32 -> (N, C, 2H, 2W) float32."""
    n, c, h, w = x.shape
    ho, wo = 2 * h, 2 * w
    b = n * c

    # Combined (smooth @ upsample) matrices, kept in float32.
    m_h = _smooth_matrix(ho) @ _bilinear_upsample_matrix(h)        # (Ho, H)
    m_w_t = (_smooth_matrix(wo) @ _bilinear_upsample_matrix(w)).T  # (W, Wo)

    tb, num_steps = _choose_tb(b, h, w)
    b_pad = tb * num_steps

    xb = x.reshape(b, h, w)                      # free view, no transpose
    if b_pad != b:
        xb = jnp.pad(xb, ((0, b_pad - b), (0, 0), (0, 0)))

    out = pl.pallas_call(
        _upsample_smooth_kernel,
        out_shape=jax.ShapeDtypeStruct((b_pad, ho, wo), jnp.float32),
        grid_spec=pltpu.PrefetchScalarGridSpec(
            num_scalar_prefetch=0,
            grid=(num_steps,),
            in_specs=[
                pl.BlockSpec((tb, h, w), lambda i: (i, 0, 0)),
                # Constant index_map -> the small matrices stay resident in
                # VMEM (no per-step re-DMA).
                pl.BlockSpec((ho, h), lambda i: (0, 0)),
                pl.BlockSpec((w, wo), lambda i: (0, 0)),
            ],
            out_specs=pl.BlockSpec((tb, ho, wo), lambda i: (i, 0, 0)),
        ),
        compiler_params=pltpu.CompilerParams(
            dimension_semantics=("parallel",),
            vmem_limit_bytes=48 * 1024 * 1024,
        ),
    )(xb, m_h, m_w_t)

    return out[:b].reshape(n, c, ho, wo)         # free view, no transpose


if __name__ == "__main__":
    key = jax.random.PRNGKey(0)
    x = jax.random.normal(key, (2, 4, 16, 16), dtype=jnp.float32)

    y = upsample_smooth(x)
    jax.block_until_ready(y)
    assert y.shape == (2, 4, 32, 32), y.shape

    # Check against a pure-JAX f32 reference.
    n, c, h, w = x.shape
    mh_ref = _smooth_matrix(2 * h) @ _bilinear_upsample_matrix(h)
    mw_ref = _smooth_matrix(2 * w) @ _bilinear_upsample_matrix(w)
    ref = jnp.einsum(
        "oh,bhw,vw->bov", mh_ref, x.reshape(n * c, h, w), mw_ref,
        precision=jax.lax.Precision.HIGHEST,
    ).reshape(n, c, 2 * h, 2 * w)
    err = float(jnp.max(jnp.abs(y - ref)))
    assert err < 2e-2, f"max abs error {err}"

    print("KERNEL_OK")
</pallas_src>

<mosaic_0001>
module attributes {stable_mosaic.version = 11 : i64} {
  func.func @_upsample_smooth_kernel(%arg0: i32, %arg1: memref<2x16x16xf32, #tpu.memory_space<vmem>>, %arg2: memref<32x16xf32, #tpu.memory_space<vmem>>, %arg3: memref<16x32xf32, #tpu.memory_space<vmem>>, %arg4: memref<2x32x32xf32, #tpu.memory_space<vmem>>) attributes {dimension_semantics = [#tpu.dimension_semantics<parallel>], iteration_bounds = array<i64: 4>, scalar_prefetch = 0 : i64, scratch_operands = 0 : i64, tpu.core_type = #tpu.core_type<tc>, window_params = [{transform_indices = @transform_0, window_bounds = array<i64: 2, 16, 16>}, {pipeline_mode = #tpu.pipeline_mode<synchronous>, transform_indices = @transform_1, window_bounds = array<i64: 32, 16>}, {pipeline_mode = #tpu.pipeline_mode<synchronous>, transform_indices = @transform_2, window_bounds = array<i64: 16, 32>}, {transform_indices = @transform_3, window_bounds = array<i64: 2, 32, 32>}]} {
    %c0 = arith.constant 0 : index
    %c0_0 = arith.constant 0 : index
    %c0_1 = arith.constant 0 : index
    %0 = vector.load %arg1[%c0, %c0_0, %c0_1] : memref<2x16x16xf32, #tpu.memory_space<vmem>>, vector<2x16x16xf32>
    %c0_2 = arith.constant 0 : index
    %c0_3 = arith.constant 0 : index
    %1 = vector.load %arg3[%c0_2, %c0_3] : memref<16x32xf32, #tpu.memory_space<vmem>>, vector<16x32xf32>
    %2 = vector.shape_cast %1 : vector<16x32xf32> to vector<1x16x32xf32>
    %3 = vector.broadcast %2 : vector<1x16x32xf32> to vector<2x16x32xf32>
    %c0_4 = arith.constant 0 : index
    %c0_5 = arith.constant 0 : index
    %4 = vector.load %arg2[%c0_4, %c0_5] : memref<32x16xf32, #tpu.memory_space<vmem>>, vector<32x16xf32>
    %5 = vector.shape_cast %4 : vector<32x16xf32> to vector<1x32x16xf32>
    %6 = vector.broadcast %5 : vector<1x32x16xf32> to vector<2x32x16xf32>
    "tpu.trace_start"() <{level = 10 : i32, message = "bhw,bwv->bhv"}> : () -> ()
    %cst = arith.constant dense<0.000000e+00> : vector<2x16x32xf32>
    %7 = tpu.matmul %0, %3, %cst {dimension_numbers = #tpu.dot_dimension_numbers<[2], [1], [1], [2], [0, 0, 0, 1, 1, 2], [0], [0]>} : vector<2x16x16xf32>, vector<2x16x32xf32>, vector<2x16x32xf32> -> vector<2x16x32xf32>
    "tpu.trace_stop"() : () -> ()
    "tpu.trace_start"() <{level = 10 : i32, message = "boh,bhv->bov"}> : () -> ()
    %cst_6 = arith.constant dense<0.000000e+00> : vector<2x32x32xf32>
    %8 = tpu.matmul %6, %7, %cst_6 {dimension_numbers = #tpu.dot_dimension_numbers<[2], [1], [1], [2], [0, 0, 0, 1, 1, 2], [0], [0]>} : vector<2x32x16xf32>, vector<2x16x32xf32>, vector<2x32x32xf32> -> vector<2x32x32xf32>
    "tpu.trace_stop"() : () -> ()
    %c0_7 = arith.constant 0 : index
    %c0_8 = arith.constant 0 : index
    %c0_9 = arith.constant 0 : index
    %9 = vector.load %arg4[%c0_7, %c0_8, %c0_9] : memref<2x32x32xf32, #tpu.memory_space<vmem>>, vector<2x32x32xf32>
    tpu.vector_store %arg4[%c0_7, %c0_8, %c0_9], %8 {strides = array<i32>} : memref<2x32x32xf32, #tpu.memory_space<vmem>>, vector<2x32x32xf32>,
    return
  }
  func.func @transform_0(%arg0: i32) -> (i32, i32, i32) {
    %c0_i32 = arith.constant 0 : i32
    %c0_i32_0 = arith.constant 0 : i32
    %c0_i32_1 = arith.constant 0 : i32
    return %arg0, %c0_i32, %c0_i32_0 : i32, i32, i32
  }
  func.func @transform_1(%arg0: i32) -> (i32, i32) {
    %c0_i32 = arith.constant 0 : i32
    %c0_i32_0 = arith.constant 0 : i32
    %c0_i32_1 = arith.constant 0 : i32
    return %c0_i32, %c0_i32_0 : i32, i32
  }
  func.func @transform_2(%arg0: i32) -> (i32, i32) {
    %c0_i32 = arith.constant 0 : i32
    %c0_i32_0 = arith.constant 0 : i32
    %c0_i32_1 = arith.constant 0 : i32
    return %c0_i32, %c0_i32_0 : i32, i32
  }
  func.func @transform_3(%arg0: i32) -> (i32, i32, i32) {
    %c0_i32 = arith.constant 0 : i32
    %c0_i32_0 = arith.constant 0 : i32
    %c0_i32_1 = arith.constant 0 : i32
    return %arg0, %c0_i32, %c0_i32_0 : i32, i32, i32
  }
}

</mosaic_0001>

<bundles_post_ra>
// kernel: tpu_custom_call.1
= control target key start
LH: loop header
LB: loop body
LE: loop exit
PB: predicated region body
PF: predicated region fallthrough
CT: control target
= control target key end

     0   :  { %8 = vsyncpa [#allocation3], 0  ;;  %s804_s0 = inlined_call_operand.hbm [shape: f32[8,16,16], index: 0, kind: input, shape index: {}]   ;;  %s805_s1 = inlined_call_operand.vmem [shape: f32[32,16], index: 1, kind: input, shape index: {}]   ;;  %s806_s2 = inlined_call_operand.vmem [shape: f32[16,32], index: 2, kind: input, shape index: {}]   ;;  %s807_s3 = inlined_call_operand.hbm [shape: f32[8,32,32], index: 3, kind: output, shape index: {}]  }
   0x1   :  { %10 = vsyncpa [#allocation3 + $0x1], 0 }
   0x2   :  { %11 = vsyncpa [#allocation4], 0 }
   0x3   :  { %13 = vsyncpa [#allocation4 + $0x1], 0  ;;  %s640_s12 = smov 0   ;;  %s642_s13 = smov 0  }
   0x4   :  { %s644_s14 = smov 0   ;;  %s646_s15 = smov 0  }
   0x5 LB: > { %s661_s16 = sadd.s32 4294967295, %s614_s15   ;;  %s432_s17 = sadd.s32 4294967294, %s614_s15   ;;  %s614_s15 = sphi %s646_s15, %s816_s15   ;;  %s610_s14 = sphi %s644_s14, %s815_s14   ;;  %s606_s13 = sphi %s642_s13, %s814_s13   ;;  %s602_s12 = sphi %s640_s12, %s813_s12  }
   0x6   : > { %s665_s18 = sadd.s32 1, %s614_s15   ;;  %s26_s19 = sadd.s32 1, %s610_s14 }
   0x7   : > { %s23_s20 = ssub.s32 %s614_s15, %s665_s18  ;;  %p33_p0 = scmp.ne.s32.totalorder %s610_s14, %s606_s13 }
   0x8   : > { %p24_p1 = scmp.eq.s32.totalorder %s23_s20, 0  ;;  %p34_p2 = scmp.eq.s32.totalorder %s614_s15, 0 }
   0x9   : > { %p39_p3 = scmp.ne.s32.totalorder %s606_s13, %s602_s12  ;;  %p40_p4 = scmp.eq.s32.totalorder %s661_s16, 0 }
   0xa   : > { %s677_s21 = scalar_select %p24_p1, %s610_s14, %s26_s19  }
   0xb   : > { %p679_p5 = por %p34_p2, %p33_p0  ;;  %p683_p6 = por %p40_p4, %p39_p3 }
   0xc   : > { %p105_p7 = scmp.eq.s32.totalorder %s661_s16, 3  ;;  %p111_p8 = scmp.eq.s32.totalorder %s432_s17, 3 }
   0xd   : > { %p480_p9 = scmp.lt.s32.totalorder %s614_s15, 4  ;;  %s137_s26 = sand.u32 1, %s610_s14  }
   0xe   : > { %p689_p10 = por %p105_p7, %p33_p0  ;;  %p693_p11 = por %p111_p8, %p39_p3 }
   0xf   : > { %s461_s27 = sshll.u32 %s614_s15, 5  ;;  %s435_s28 = sshll.u32 %s137_s26, 5 }
  0x10   : > { %s147_s4 = scalar_lea.hbm %s804_s0, %s461_s27  ;;  %s141_s6 = scalar_lea.vmem [#allocation2], %s435_s28 }
  0x11   : > { %s148_s5 = sshll.u32 %s147_s4, 4  ;;  %s150_s7 = sshll.u32 %s141_s6, 4  ;;  %s149_s5 = int_to_ptr.hbm [resolvable:$true] %s148_s5  ;;  %s151_s7 = int_to_ptr.vmem [resolvable:$true] %s150_s7 }
  0x12   : > { %p704_p12 = pnand %p480_p9, %p679_p5  ;;  %p439_p13 = scmp.ge.s32.totalorder %s614_s15, 1 }
  0x13   : > { %p158_p0 = scmp.lt.s32.totalorder %s614_s15, 5  ;;  %s138_s9 = scalar_lea.sflag [#allocation3], %s137_s26 }
  0x14   : > { %s518_s10 = sshra.s32 %s149_s5, 4  ;;  %p522_p2 = pneg %p704_p12  ;;  %s519_s10 = int_to_ptr.hbm [resolvable:$true] %s518_s10 }
  0x15   : > { %s520_s11 = scalar_lea.hbm %s519_s10, 32  ;;  %s525_s20 = scalar_lea.hbm %s804_s0, 128 }
  0x16   : > { %p521_p1 = scmp.ne.s32.totalorder %s519_s10, %s520_s11  ;;  %p526_p5 = scmp.lt.s32.totalorder %s519_s10, %s804_s0 }
  0x17   : > { %p527_p7 = scmp.lt.s32.totalorder %s525_s20, %s520_s11 }
  0x18   : > { %p523_p3 = pnand %p522_p2, %p521_p1 }
  0x19   : > { %p528_p8 = por %p527_p7, %p526_p5 }
  0x1a   : > { %p524_p4 = pneg %p523_p3 }
  0x1c   : > { %p529_p9 = pnand %p528_p8, %p524_p4 }
  0x1e   : > { %532 = shalt.err (!%p529_p9)
}
  0x1f   : > { %s616_s26 = smov 128   ;;  %s617_s28 = smov 8  }
  0x20   : > { %475 = dma.hbm_to_vmem [thread:$0]  (!%p704_p12), %s149_s5, 512, %s151_s7, %s138_s9, %s616_s26, %s616_s26, %s617_s28  }
  0x21   : > { %p159_p1 = pnand %p439_p13, %p158_p0 }
  0x22   : > { %s725_s29 = sand.u32 (!%p159_p1), 1, %s606_s13  }
  0x23   : > { %162 = sbr.rel (%p159_p1) target bundleno = 336 (0x150), region = 32  ;;  %s440_s30 = sshll.u32 (!%p159_p1), %s725_s29, 5 }
  0x24   : > { %s165_s4 = scalar_lea.sflag (!%p159_p1), [#allocation3], %s725_s29  ;;  %s168_s6 = scalar_lea.vmem (!%p159_p1), [#allocation2], %s440_s30 }
  0x28   : > { %593 = dma.done.wait (%p683_p6), %s165_s4, 512  }
  0x29   : > { %595 = vsyncadd (%p683_p6), %s165_s4, 4294966784  ;;  %v199_v0 = vld [vmem:[%s806_s2 + $0x8] sm:$0xff]  ;;  %v198_v1 = vld [vmem:[%s806_s2] sm:$0xff]  ;;  %vm204_vm0 = vcmask 130048   ;;  %s441_s26 = sshll.u32 %s725_s29, 6  ;;  %vm333_vm1 = vcmask 261120  }
  0x2a   : > { %225 = vmatpush.msra.mxu0 %v199_v0  ;;  %254 = vmatpush.msra.mxu1 %v199_v0  ;;  %v194_v2 = vld [vmem:[%s168_s6] sm:$0xff]  ;;  %v196_v3 = vld [vmem:[%s168_s6 + $0x10] sm:$0xff]  ;;  %v195_v4 = vld [vmem:[%s168_s6 + $0x8] sm:$0xff]  ;;  %s191_s28 = scalar_lea.vmem [#allocation5], %s441_s26  ;;  %s463_s30 = sshll.u32 %s661_s16, 6 }
  0x2b   : > { %v197_v5 = vld [vmem:[%s168_s6 + $0x18] sm:$0xff]  ;;  %v201_v10 = vld [vmem:[%s805_s1 + $0x8] sm:$0xff]  ;;  %v200_v11 = vld [vmem:[%s805_s1] sm:$0xff]  ;;  %s355_s8 = scalar_lea.hbm %s807_s3, %s463_s30  ;;  %s356_s5 = sshll.u32 %s191_s28, 4  ;;  %s357_s5 = int_to_ptr.vmem [resolvable:$true] %s356_s5 }
  0x2c   : > { %226 = vmatpush.msra.mxu0 %v198_v1  ;;  %255 = vmatpush.msra.mxu1 %v198_v1  ;;  %v202_v12 = vld [vmem:[%s805_s1 + $0x10] sm:$0xff]  ;;  %v203_v13 = vld [vmem:[%s805_s1 + $0x18] sm:$0xff]  ;;  %s358_s7 = sshll.u32 %s355_s8, 4  ;;  %s343_s16 = scalar_lea.sflag [#allocation4], %s725_s29  ;;  %s359_s7 = int_to_ptr.hbm [resolvable:$true] %s358_s7 }
  0x2d   : > { %442 = vmatmul.msk.f32.vlgmr.msra.gmra.mxu0 %vm204_vm0, %v194_v2  ;;  %444 = vmatmul.msk.f32.vlgmr.msra.gmra.mxu1 %vm204_vm0, %v196_v3  ;;  %s562_s9 = sshra.s32 %s359_s7, 4  ;;  %s568_s17 = scalar_lea.hbm %s807_s3, 256  ;;  %s563_s9 = int_to_ptr.hbm [resolvable:$true] %s562_s9 }
  0x2e   : > { %s564_s23 = scalar_lea.hbm %s563_s9, 64  ;;  %p569_p0 = scmp.lt.s32.totalorder %s563_s9, %s807_s3 }
  0x2f   : > { %p565_p6 = scmp.ne.s32.totalorder %s563_s9, %s564_s23  ;;  %p570_p2 = scmp.lt.s32.totalorder %s568_s17, %s564_s23 }
  0x31   : > { %p566_p12 = pnand %p565_p6, %p689_p10  ;;  %p571_p3 = por %p570_p2, %p569_p0 }
  0x33   : > { %p567_p13 = pneg %p566_p12 }
  0x35   : > { %443 = vmatmul.msk.f32.gmra.mxu0 %vm204_vm0, %v195_v4  ;;  %445 = vmatmul.msk.f32.gmra.mxu1 %vm204_vm0, %v197_v5  ;;  %p572_p4 = pnand %p571_p3, %p567_p13 }
  0xaa   : > { %v228_v6 = vpop.f32.mrf.mxu0  ;;  %v257_v7 = vpop.f32.mrf.mxu1 }
  0xb2   : > { %v231_v8 = vpop.f32.mrf.mxu0  ;;  %v260_v9 = vpop.f32.mrf.mxu1 }
  0xb3   : > { %289 = vmatpush.msrb.mxu0 %v231_v8  ;;  %464 = vmatpush.msra.mxu2 %v231_v8 }
  0xb4   : > { %318 = vmatpush.msrb.mxu1 %v260_v9  ;;  %466 = vmatpush.msra.mxu3 %v260_v9 }
  0xb5   : > { %290 = vmatpush.msrb.mxu0 %v228_v6  ;;  %465 = vmatpush.msra.mxu2 %v228_v6 }
  0xb6   : > { %319 = vmatpush.msrb.mxu1 %v257_v7  ;;  %467 = vmatpush.msra.mxu3 %v257_v7 }
  0xb7   : > { %447 = vmatmul.msk.f32.vlgmr.msra.gmra.mxu2 %vm204_vm0, %v201_v10  ;;  %451 = vmatmul.msk.f32.vlgmr.msra.gmra.mxu3 %vm204_vm0, %v201_v10 }
  0xb8   : > { %446 = vmatmul.msk.f32.vlgmr.msrb.gmra.mxu0 %vm204_vm0, %v200_v11  ;;  %450 = vmatmul.msk.f32.vlgmr.msrb.gmra.mxu1 %vm204_vm0, %v200_v11 }
  0xbf   : > { %448 = vmatmul.msk.f32.gmra.mxu2 %vm204_vm0, %v202_v12  ;;  %452 = vmatmul.msk.f32.gmra.mxu3 %vm204_vm0, %v202_v12 }
  0xc7   : > { %449 = vmatmul.msk.f32.gmra.mxu2 %vm204_vm0, %v203_v13  ;;  %453 = vmatmul.msk.f32.gmra.mxu3 %vm204_vm0, %v203_v13 }
 0x135   : > { %v292_v14 = vpop.f32.mrf.mxu0  ;;  %v321_v15 = vpop.f32.mrf.mxu1 }
 0x136   : > { %334 = vst.msk [vmem:[%s191_s28] sm:$0xff] %vm333_vm1, %v292_v14 }
 0x137   : > { %338 = vst.msk [vmem:[%s191_s28 + $0x20] sm:$0xff] %vm333_vm1, %v321_v15 }
 0x13a   : > { %v295_v16 = vpop.f32.mrf.mxu2  ;;  %v324_v17 = vpop.f32.mrf.mxu3 }
 0x13b   : > { %335 = vst.msk [vmem:[%s191_s28 + $0x8] sm:$0xff] %vm333_vm1, %v295_v16 }
 0x13c   : > { %339 = vst.msk [vmem:[%s191_s28 + $0x28] sm:$0xff] %vm333_vm1, %v324_v17 }
 0x142   : > { %v298_v18 = vpop.f32.mrf.mxu2  ;;  %v327_v19 = vpop.f32.mrf.mxu3 }
 0x143   : > { %336 = vst.msk [vmem:[%s191_s28 + $0x10] sm:$0xff] %vm333_vm1, %v298_v18 }
 0x144   : > { %340 = vst.msk [vmem:[%s191_s28 + $0x30] sm:$0xff] %vm333_vm1, %v327_v19 }
 0x14a   : > { %v301_v20 = vpop.f32.mrf.mxu2  ;;  %v330_v21 = vpop.f32.mrf.mxu3 }
 0x14b   : > { %337 = vst.msk [vmem:[%s191_s28 + $0x18] sm:$0xff] %vm333_vm1, %v301_v20 }
 0x14c   : > { %341 = vst.msk [vmem:[%s191_s28 + $0x38] sm:$0xff] %vm333_vm1, %v330_v21 }
 0x14d   : > { %575 = shalt.err (!%p572_p4)
}
 0x14e   : > { %s618_s29 = smov 128   ;;  %s619_s22 = smov 8  }
 0x14f   : > { %470 = dma.vmem_to_hbm [thread:$0]  (%p689_p10), %s357_s5, 1024, %s359_s7, %s343_s16, %s618_s29, %s618_s29, %s619_s22  }
 0x150 PF: > { %p481_p5 = scmp.ge.s32.totalorder %s614_s15, 2  ;;  %s373_s27 = sand.u32 1, %s602_s12  }
 0x151   : > { %s374_s26 = scalar_lea.sflag [#allocation4], %s373_s27 }
 0x152   : > { %p477_p7 = pnand %p481_p5, %p693_p11 }
 0x154   : > { %p478_p8 = pneg %p477_p7 }
 0x156   : > { %597 = dma.done.wait (%p478_p8), %s374_s26, 1024  }
 0x157   : > { %599 = vsyncadd (%p478_p8), %s374_s26, 4294966272  ;;  %p16_p9 = scmp.ge.s32.totalorder %s665_s18, 6   ;;  %s813_s12 = smov %s606_s13 }
 0x158   : > { %s814_s13 = smov %s610_s14  ;;  %s815_s14 = smov %s677_s21 }
 0x159   : > { %s816_s15 = smov %s665_s18  ;;  %18 = sbr.rel (!%p16_p9) target bundleno = 5 (0x5), region = 77 }
 0x15e   :  { %380 = vsyncpa [#allocation3], 1 }
 0x15f   :  { %382 = vsyncpa [#allocation3 + $0x1], 1 }
 0x160   :  { %383 = vsyncpa [#allocation4], 1 }
 0x161   :  { %385 = vsyncpa [#allocation4 + $0x1], 1 }

</bundles_post_ra>
